<compile_context>
chip_gen: v6e
topology: v6e:2x2x1
jax: 0.10.0
libtpu: 0.0.40
codegen_flags: <defaults>
</compile_context>

<pallas_src>
import functools

import jax
import jax.numpy as jnp
from jax.experimental import pallas as pl
from jax.experimental.pallas import tpu as pltpu


# --------------------------------------------------------------------------- #
# Helpers
# --------------------------------------------------------------------------- #
def _round_up(v, m):
    return -(-v // m) * m


def _cdiv(a, b):
    return -(-a // b)


def _vmem_caps():
    """(physical VMEM bytes, usable budget with headroom) for this generation."""
    cap = 64 << 20  # conservative default = v7x physical VMEM per TensorCore
    try:
        info = pltpu.get_tpu_info()
        cap = int(getattr(info, "vmem_capacity_bytes", cap)) or cap
    except Exception:
        pass
    budget = max(cap - (12 << 20), 16 << 20)
    return cap, budget


def _constant_block_spec(shape, index_map):
    """BlockSpec for a block whose index_map is constant across the grid.

    Such a block is fetched exactly once, so a single VMEM buffer suffices;
    default double-buffering would waste a full extra copy (matters for the
    resident weight on v7x's 64 MiB VMEM). Falls back gracefully if this JAX
    version does not accept pipeline_mode.
    """
    try:
        return pl.BlockSpec(shape, index_map, pipeline_mode=pl.Buffered(1))
    except TypeError:
        return pl.BlockSpec(shape, index_map)


def _choose_tk(D, P_pad, w_itemsize, budget):
    """Contraction tile. Full-D resident weight when it fits comfortably,
    otherwise K tiles in multiples of 128 (double-buffered)."""
    if D * P_pad * w_itemsize <= budget // 3:
        return D, False
    per_row = P_pad * w_itemsize
    max_tk = max(128, ((budget // 6) // per_row) // 128 * 128)
    # Prefer a tk that divides D exactly (no masked ragged K tile).
    for cand in range(min(max_tk, _round_up(D, 128)), 127, -128):
        if D % cand == 0:
            return cand, False
    tk = min(max_tk, _round_up(D, 128))
    return tk, True
    # TODO(synk): for extreme P where even a (tb, P_pad) output block exceeds
    # the v7x VMEM budget, add a P grid axis with two-pass normalization.


def _normalize_rows(y):
    # torch F.normalize(p=2, dim=-1, eps=1e-12): y / max(||y||, 1e-12)
    #   == y * rsqrt(max(sum(y^2), 1e-24)); rsqrt runs on the EUP slot.
    sumsq = jnp.sum(y * y, axis=-1, keepdims=True)
    return y * jax.lax.rsqrt(jnp.maximum(sumsq, 1e-24))


# --------------------------------------------------------------------------- #
# Kernels
# --------------------------------------------------------------------------- #
def _proj_kernel_resident(x_ref, w_ref, b_ref, o_ref, *, compute_dtype):
    # x_ref: (tb, D) input dtype; w_ref: (D, P_pad) compute dtype (pre-cast once)
    # b_ref: (1, P_pad) f32;       o_ref: (tb, P_pad) out dtype
    x = x_ref[...].astype(compute_dtype)  # cast in-register, hidden under DMA
    y = jnp.dot(x, w_ref[...], preferred_element_type=jnp.float32)
    y = y + b_ref[...]
    o_ref[...] = _normalize_rows(y).astype(o_ref.dtype)


def _proj_kernel_ktiled(x_ref, w_ref, b_ref, o_ref, acc_ref, *,
                        compute_dtype, d_total, tk, ragged_k):
    # Grid: (batch tiles [parallel], K tiles [arbitrary]); f32 accumulator scratch.
    k = pl.program_id(1)

    @pl.when(k == 0)
    def _init():
        acc_ref[...] = jnp.zeros_like(acc_ref)

    x = x_ref[...]
    w = w_ref[...]
    if ragged_k:  # static Python flag: only emitted when D % tk != 0
        base = k * tk
        col = base + jax.lax.broadcasted_iota(jnp.int32, x.shape, 1)
        row = base + jax.lax.broadcasted_iota(jnp.int32, w.shape, 0)
        x = jnp.where(col < d_total, x, jnp.zeros_like(x))
        w = jnp.where(row < d_total, w, jnp.zeros_like(w))

    acc_ref[...] += jnp.dot(x.astype(compute_dtype), w,
                            preferred_element_type=jnp.float32)

    @pl.when(k == pl.num_programs(1) - 1)
    def _finalize():
        y = acc_ref[...] + b_ref[...]
        o_ref[...] = _normalize_rows(y).astype(o_ref.dtype)


# --------------------------------------------------------------------------- #
# Parameter preparation (once) + forward (per call)
# --------------------------------------------------------------------------- #
def prepare_projection_params(w, b, *, compute_dtype=jnp.bfloat16):
    """One-time packing of the Linear params.

    w: (D, P) (= torch weight transposed), b: (P,).
    Pads P to a lane-dense multiple of 128 (zero columns contribute nothing to
    the L2 norm) and casts the weight to the MXU compute dtype. Do this once at
    init; the per-call path then launches the kernel with no extra HBM passes.
    """
    D, P = w.shape
    assert b.shape == (P,)
    P_pad = _round_up(P, 128)
    if P_pad != P:
        w = jnp.pad(w, ((0, 0), (0, P_pad - P)))
        b = jnp.pad(b, (0, P_pad - P))
    return {
        "w": w.astype(compute_dtype),
        "b": b.reshape(1, P_pad).astype(jnp.float32),
        "out_features": P,
        "compute_dtype": compute_dtype,
    }


def projection_head_forward(x, params, *, out_dtype=jnp.float32,
                            tile_b_max=1024, force_tk=None):
    """x: (B, D) -> (B, P) out_dtype. params from prepare_projection_params."""
    w = params["w"]
    b2 = params["b"]
    P = params["out_features"]
    compute_dtype = params["compute_dtype"]

    B, D = x.shape
    Dw, P_pad = w.shape
    assert D == Dw

    cap, budget = _vmem_caps()
    xi = jnp.dtype(x.dtype).itemsize
    ci = jnp.dtype(compute_dtype).itemsize
    oi = jnp.dtype(out_dtype).itemsize

    # ---- contraction tiling ------------------------------------------------ #
    if force_tk is not None:
        tk, ragged_k = force_tk, (D % force_tk != 0)
    else:
        tk, ragged_k = _choose_tk(D, P_pad, ci, budget)
    nk = _cdiv(D, tk)
    resident = (tk == D)  # whole weight resident in VMEM, single-buffered

    # ---- batch tiling ------------------------------------------------------ #
    # bf16 vregs pack (16,128); int8/fp8 pack (32,128) -> align accordingly.
    sub = 8 if ci >= 4 else (16 if ci == 2 else 32)
    tb = min(tile_b_max, _round_up(B, sub))
    if B > sub:
        # >=2 batch grid steps so the "parallel" axis shards across both v7x TCs.
        tb = min(tb, _round_up(_cdiv(B, 2), sub))
    tb = max(tb, sub)

    def footprint(tb_):
        x_buf = 2 * tb_ * tk * xi                           # double-buffered input
        w_buf = (1 if resident else 2) * tk * P_pad * ci    # single-buffered if resident
        b_buf = P_pad * 4
        o_buf = 2 * tb_ * P_pad * oi                        # double-buffered output
        tmp = 2 * tb_ * P_pad * 4                           # f32 accumulator + y temps
        return x_buf + w_buf + b_buf + o_buf + tmp

    while footprint(tb) > budget and tb > sub:
        tb = max(sub, _round_up(tb // 2, sub))
    nb = _cdiv(B, tb)

    fp = footprint(tb)
    vmem_limit = int(min(cap - (4 << 20), max(fp + (8 << 20), 32 << 20)))

    cost = pl.CostEstimate(
        flops=2 * B * D * P_pad,
        transcendentals=B,
        bytes_accessed=xi * B * D + ci * D * P_pad + 4 * P_pad + oi * B * P_pad,
    )

    if resident:
        kernel = functools.partial(_proj_kernel_resident, compute_dtype=compute_dtype)
        out = pl.pallas_call(
            kernel,
            out_shape=jax.ShapeDtypeStruct((B, P_pad), out_dtype),
            grid=(nb,),
            in_specs=[
                pl.BlockSpec((tb, D), lambda i: (i, 0)),
                _constant_block_spec((D, P_pad), lambda i: (0, 0)),
                _constant_block_spec((1, P_pad), lambda i: (0, 0)),
            ],
            out_specs=pl.BlockSpec((tb, P_pad), lambda i: (i, 0)),
            compiler_params=pltpu.CompilerParams(
                dimension_semantics=("parallel",),
                vmem_limit_bytes=vmem_limit,
            ),
            cost_estimate=cost,
        )(x, w, b2)
    else:
        kernel = functools.partial(
            _proj_kernel_ktiled, compute_dtype=compute_dtype,
            d_total=D, tk=tk, ragged_k=ragged_k)
        out = pl.pallas_call(
            kernel,
            out_shape=jax.ShapeDtypeStruct((B, P_pad), out_dtype),
            grid=(nb, nk),
            in_specs=[
                pl.BlockSpec((tb, tk), lambda i, k: (i, k)),
                pl.BlockSpec((tk, P_pad), lambda i, k: (k, 0)),
                _constant_block_spec((1, P_pad), lambda i, k: (0, 0)),
            ],
            out_specs=pl.BlockSpec((tb, P_pad), lambda i, k: (i, 0)),
            scratch_shapes=[pltpu.VMEM((tb, P_pad), jnp.float32)],
            compiler_params=pltpu.CompilerParams(
                dimension_semantics=("parallel", "arbitrary"),
                vmem_limit_bytes=vmem_limit,
            ),
            cost_estimate=cost,
        )(x, w, b2)

    if P_pad != P:
        out = out[:, :P]
    return out


# --------------------------------------------------------------------------- #
# Reference + self-test
# --------------------------------------------------------------------------- #
def _reference(x, w, b):
    y = x @ w + b
    n = jnp.sqrt(jnp.sum(y * y, axis=-1, keepdims=True))
    return y / jnp.maximum(n, 1e-12)


if __name__ == "__main__":
    key = jax.random.PRNGKey(0)

    def make(k, B, D, P):
        kx, kw, kb = jax.random.split(k, 3)
        bound = 1.0 / (D ** 0.5)  # nn.Linear-style init; weight stored as (D, P) = W^T
        x = jax.random.normal(kx, (B, D), dtype=jnp.float32)
        w = jax.random.uniform(kw, (D, P), minval=-bound, maxval=bound, dtype=jnp.float32)
        b = jax.random.uniform(kb, (P,), minval=-bound, maxval=bound, dtype=jnp.float32)
        return x, w, b

    k1, k2, k3 = jax.random.split(key, 3)

    # Case 1: module-like small shape (input_dim=32, projection_dim=128, batch=16).
    x, w, b = make(k1, 16, 32, 128)
    ref = _reference(x, w, b)
    p_f32 = prepare_projection_params(w, b, compute_dtype=jnp.float32)
    out = jax.block_until_ready(projection_head_forward(x, p_f32))
    assert out.shape == (16, 128)
    assert jnp.allclose(out, ref, atol=1e-4, rtol=1e-4)
    p_bf16 = prepare_projection_params(w, b, compute_dtype=jnp.bfloat16)
    out_bf = jax.block_until_ready(projection_head_forward(x, p_bf16))
    assert out_bf.shape == (16, 128)
    assert jnp.allclose(out_bf, ref, atol=2e-2, rtol=2e-2)

    # Case 2: K-tiled path (forced), non-128-multiple P, ragged batch tile.
    x, w, b = make(k2, 24, 384, 96)
    ref = _reference(x, w, b)
    p = prepare_projection_params(w, b, compute_dtype=jnp.float32)
    out = jax.block_until_ready(projection_head_forward(x, p, force_tk=128))
    assert out.shape == (24, 96)
    assert jnp.allclose(out, ref, atol=1e-4, rtol=1e-4)

    # Case 3: ragged contraction (D % tk != 0) exercises the masked last K tile.
    x, w, b = make(k3, 24, 200, 80)
    ref = _reference(x, w, b)
    p = prepare_projection_params(w, b, compute_dtype=jnp.float32)
    out = jax.block_until_ready(projection_head_forward(x, p, force_tk=128))
    assert out.shape == (24, 80)
    assert jnp.allclose(out, ref, atol=1e-4, rtol=1e-4)

    print("KERNEL_OK")
</pallas_src>

<mosaic_0001>
module attributes {stable_mosaic.version = 11 : i64} {
  func.func @_proj_kernel_resident(%arg0: i32, %arg1: memref<8x32xf32, #tpu.memory_space<vmem>>, %arg2: memref<32x128xf32, #tpu.memory_space<vmem>>, %arg3: memref<1x128xf32, #tpu.memory_space<vmem>>, %arg4: memref<8x128xf32, #tpu.memory_space<vmem>>) attributes {dimension_semantics = [#tpu.dimension_semantics<parallel>], iteration_bounds = array<i64: 2>, scalar_prefetch = 0 : i64, scratch_operands = 0 : i64, tpu.core_type = #tpu.core_type<tc>, window_params = [{transform_indices = @transform_0, window_bounds = array<i64: 8, 32>}, {pipeline_mode = #tpu.pipeline_mode<synchronous>, transform_indices = @transform_1, window_bounds = array<i64: 32, 128>}, {pipeline_mode = #tpu.pipeline_mode<synchronous>, transform_indices = @transform_2, window_bounds = array<i64: 1, 128>}, {transform_indices = @transform_3, window_bounds = array<i64: 8, 128>}]} {
    %c0 = arith.constant 0 : index
    %c0_0 = arith.constant 0 : index
    %0 = vector.load %arg1[%c0, %c0_0] : memref<8x32xf32, #tpu.memory_space<vmem>>, vector<8x32xf32>
    %c0_1 = arith.constant 0 : index
    %c0_2 = arith.constant 0 : index
    %1 = vector.load %arg2[%c0_1, %c0_2] : memref<32x128xf32, #tpu.memory_space<vmem>>, vector<32x128xf32>
    %cst = arith.constant dense<0.000000e+00> : vector<8x128xf32>
    %2 = tpu.matmul %0, %1, %cst {dimension_numbers = #tpu.dot_dimension_numbers<[1], [0], [0], [1], [0, 0, 1, 1], [], []>} : vector<8x32xf32>, vector<32x128xf32>, vector<8x128xf32> -> vector<8x128xf32>
    %c0_3 = arith.constant 0 : index
    %c0_4 = arith.constant 0 : index
    %3 = vector.load %arg3[%c0_3, %c0_4] : memref<1x128xf32, #tpu.memory_space<vmem>>, vector<1x128xf32>
    %4 = vector.broadcast %3 : vector<1x128xf32> to vector<8x128xf32>
    %5 = arith.addf %2, %4 : vector<8x128xf32>
    %6 = arith.mulf %5, %5 : vector<8x128xf32>
    %cst_5 = arith.constant dense<0.000000e+00> : vector<8xf32>
    %7 = vector.multi_reduction <add>, %6, %cst_5 [1] : vector<8x128xf32> to vector<8xf32>
    %8 = vector.shape_cast %7 : vector<8xf32> to vector<8x1xf32>
    %cst_6 = arith.constant 1.000000e-24 : f32
    %9 = vector.broadcast %cst_6 : f32 to vector<8x1xf32>
    %10 = arith.maximumf %8, %9 : vector<8x1xf32>
    %11 = math.rsqrt %10 : vector<8x1xf32>
    %12 = vector.broadcast %11 : vector<8x1xf32> to vector<8x128xf32>
    %13 = arith.mulf %5, %12 : vector<8x128xf32>
    %c0_7 = arith.constant 0 : index
    %c0_8 = arith.constant 0 : index
    %14 = vector.load %arg4[%c0_7, %c0_8] : memref<8x128xf32, #tpu.memory_space<vmem>>, vector<8x128xf32>
    tpu.vector_store %arg4[%c0_7, %c0_8], %13 {strides = array<i32>} : memref<8x128xf32, #tpu.memory_space<vmem>>, vector<8x128xf32>,
    return
  }
  func.func @transform_0(%arg0: i32) -> (i32, i32) {
    %c0_i32 = arith.constant 0 : i32
    %c0_i32_0 = arith.constant 0 : i32
    return %arg0, %c0_i32 : i32, i32
  }
  func.func @transform_1(%arg0: i32) -> (i32, i32) {
    %c0_i32 = arith.constant 0 : i32
    %c0_i32_0 = arith.constant 0 : i32
    %c0_i32_1 = arith.constant 0 : i32
    return %c0_i32, %c0_i32_0 : i32, i32
  }
  func.func @transform_2(%arg0: i32) -> (i32, i32) {
    %c0_i32 = arith.constant 0 : i32
    %c0_i32_0 = arith.constant 0 : i32
    %c0_i32_1 = arith.constant 0 : i32
    return %c0_i32, %c0_i32_0 : i32, i32
  }
  func.func @transform_3(%arg0: i32) -> (i32, i32) {
    %c0_i32 = arith.constant 0 : i32
    %c0_i32_0 = arith.constant 0 : i32
    return %arg0, %c0_i32 : i32, i32
  }
}

</mosaic_0001>

<bundles_post_ra>
// kernel: tpu_custom_call.1
= control target key start
LH: loop header
LB: loop body
LE: loop exit
PB: predicated region body
PF: predicated region fallthrough
CT: control target
= control target key end

     0   :  { %8 = vsyncpa [#allocation3], 0  ;;  %s795_s0 = inlined_call_operand.hbm [shape: f32[16,32], index: 0, kind: input, shape index: {}]   ;;  %s796_s1 = inlined_call_operand.hbm [shape: f32[32,128], index: 1, kind: input, shape index: {}]   ;;  %s797_s2 = inlined_call_operand.vmem [shape: f32[1,128], index: 2, kind: input, shape index: {}]   ;;  %s798_s3 = inlined_call_operand.hbm [shape: f32[16,128], index: 3, kind: output, shape index: {}]  }
   0x1   :  { %10 = vsyncpa [#allocation3 + $0x1], 0 }
   0x2   :  { %11 = vsyncpa [#allocation6], 0 }
   0x3   :  { %12 = vsyncpa [#allocation4], 0 }
   0x4   :  { %14 = vsyncpa [#allocation4 + $0x1], 0  ;;  %s634_s12 = smov 0   ;;  %s636_s13 = smov 0  }
   0x5   :  { %s638_s14 = smov 0   ;;  %s640_s15 = smov 0  }
   0x6 LB: > { %s655_s16 = sadd.s32 4294967295, %s605_s15   ;;  %s388_s17 = sadd.s32 4294967294, %s605_s15   ;;  %s605_s15 = sphi %s640_s15, %s820_s15   ;;  %s601_s14 = sphi %s638_s14, %s819_s14   ;;  %s597_s13 = sphi %s636_s13, %s818_s13   ;;  %s593_s12 = sphi %s634_s12, %s817_s12  }
   0x7   : > { %p40_p0 = scmp.ne.s32.totalorder %s597_s13, %s593_s12  ;;  %p799_p1 = scmp.eq.s32.totalorder %s655_s16, 0 }
   0x8   : > { %p112_p3 = scmp.eq.s32.totalorder %s388_s17, 1  ;;  %p389_p5 = scmp.ge.s32.totalorder %s605_s15, 1 }
   0x9   : > { %p664_p4 = por %p799_p1, %p40_p0  ;;  %p119_p7 = scmp.lt.s32.totalorder %s605_s15, 3 }
   0xa   : > { %p669_p6 = por %p112_p3, %p40_p0  ;;  %s607_s21 = smov [#allocation5]  }
   0xb   : > { %s803_s18 = scalar_select %p664_p4, 1, 0 }
   0xc   : > { %s804_s19 = scalar_select %p669_p6, 1, 0 }
   0xd   : > { %p674_p8 = pnand %p389_p5, %p119_p7  ;;  %s131_s22 = sshll.u32 %s607_s21, 4  ;;  %s132_s22 = int_to_ptr.vmem [resolvable:$true] %s131_s22 }
   0xe   : > { %s688_s24 = sadd.s32 1, %s605_s15   ;;  %s27_s25 = sadd.s32 1, %s601_s14 }
   0xf   : > { %s805_s20 = scalar_select %p674_p8, 1, 0 }
  0x10   : > { %p428_p9 = pneg %p674_p8  ;;  %s24_s26 = ssub.s32 %s605_s15, %s688_s24 }
  0x11   : > { %s494_s27 = scalar_lea.vmem %s132_s22, 512  ;;  %p502_p5 = scmp.lt.s32.totalorder %s132_s22, %s132_s22 }
  0x12   : > { %p683_p11 = pnand %p428_p9, %p799_p1  ;;  %p495_p13 = scmp.ne.s32.totalorder %s132_s22, %s494_s27 }
  0x13   : > { %p503_p7 = scmp.lt.s32.totalorder %s494_s27, %s494_s27 }
  0x14   : > { %p485_p12 = pneg %p683_p11 }
  0x15   : > { %p504_p10 = por %p503_p7, %p502_p5 }
  0x16   : > { %p497_p0 = pnand %p495_p13, %p485_p12 }
  0x18   : > { %p498_p3 = pneg %p497_p0 }
  0x1a   : > { %p505_p2 = pnand %p504_p10, %p498_p3 }
  0x1c   : > { %508 = shalt.err (!%p505_p2)
}
  0x1d   : > { %s608_s28 = smov 128   ;;  %s609_s29 = smov 8  }
  0x1e   : > { %431 = dma.hbm_to_vmem [thread:$0]  (!%p683_p11), %s796_s1, 512, %s132_s22, [#allocation6], %s608_s28, %s608_s28, %s609_s29  }
  0x1f   : > { %p25_p9 = scmp.eq.s32.totalorder %s24_s26, 0  ;;  %p34_p12 = scmp.ne.s32.totalorder %s601_s14, %s597_s13 }
  0x20   : > { %p35_p10 = scmp.eq.s32.totalorder %s605_s15, 0  ;;  %p441_p2 = scmp.lt.s32.totalorder %s605_s15, 2 }
  0x21   : > { %s705_s5 = scalar_select %p25_p9, %s601_s14, %s27_s25  }
  0x22   : > { %p36_p13 = por %p35_p10, %p34_p12  ;;  %p807_p0 = scmp.eq.s32.totalorder %s655_s16, 1 }
  0x23   : > { %s148_s7 = sand.u32 1, %s601_s14   ;;  %s393_s8 = sshll.u32 %s605_s15, 7 }
  0x24   : > { %p709_p3 = por %p807_p0, %p34_p12  ;;  %s392_s9 = sshll.u32 %s148_s7, 3 }
  0x25   : > { %s718_s17 = scalar_lea.hbm %s795_s0, %s393_s8  ;;  %s152_s21 = scalar_lea.vmem [#allocation2], %s392_s9 }
  0x26   : > { %s808_s6 = scalar_select %p709_p3, 1, 0 }
  0x27   : > { %s159_s22 = sshll.u32 %s152_s21, 4  ;;  %p720_p11 = pnand %p441_p2, %p36_p13  ;;  %s160_s22 = int_to_ptr.vmem [resolvable:$true] %s159_s22 }
  0x28   : > { %s149_s25 = scalar_lea.sflag [#allocation3], %s148_s7  ;;  %s509_s26 = scalar_lea.hbm %s718_s17, 128 }
  0x29   : > { %p510_p5 = scmp.ne.s32.totalorder %s718_s17, %s509_s26  ;;  %p511_p7 = pneg %p720_p11 }
  0x2a   : > { %s514_s29 = scalar_lea.hbm %s795_s0, 256  ;;  %p515_p10 = scmp.lt.s32.totalorder %s718_s17, %s795_s0 }
  0x2b   : > { %p512_p9 = pnand %p511_p7, %p510_p5  ;;  %p516_p2 = scmp.lt.s32.totalorder %s514_s29, %s509_s26 }
  0x2d   : > { %p513_p12 = pneg %p512_p9  ;;  %p517_p13 = por %p516_p2, %p515_p10 }
  0x2f   : > { %p518_p0 = pnand %p517_p13, %p513_p12 }
  0x31   : > { %521 = shalt.err (!%p518_p0)
}
  0x32   : > { %s522_s8 = scalar_lea.vmem %s160_s22, 128  ;;  %s610_s7 = smov [#allocation2]  }
  0x33   : > { %p523_p1 = scmp.ne.s32.totalorder %s160_s22, %s522_s8  ;;  %s527_s9 = sshll.u32 %s610_s7, 4  ;;  %s528_s9 = int_to_ptr.vmem [resolvable:$false] %s527_s9 }
  0x34   : > { %s529_s10 = scalar_lea.vmem %s528_s9, 256  ;;  %p530_p5 = scmp.lt.s32.totalorder %s160_s22, %s528_s9 }
  0x35   : > { %p525_p6 = pnand %p523_p1, %p511_p7  ;;  %p531_p9 = scmp.lt.s32.totalorder %s529_s10, %s522_s8 }
  0x37   : > { %p526_p3 = pneg %p525_p6  ;;  %p532_p4 = por %p531_p9, %p530_p5 }
  0x39   : > { %p533_p8 = pnand %p532_p4, %p526_p3 }
  0x3b   : > { %536 = shalt.err (!%p533_p8)
}
  0x3c   : > { %435 = dma.hbm_to_vmem [thread:$0]  (!%p720_p11), %s718_s17, 128, %s160_s22, %s149_s25  }
  0x3d   : > { %p810_p12 = scmp.ne.s32.totalorder %s805_s20, 0 }
  0x3e   : > { %s741_s11 = sand.u32 (!%p810_p12), 1, %s597_s13   ;;  %p811_p1 = scmp.ne.s32.totalorder (!%p810_p12), %s803_s18, 0 }
  0x3f   : > { %168 = sbr.rel (%p810_p12) target bundleno = 447 (0x1bf), region = 32  ;;  %s395_s21 = sshll.u32 (!%p810_p12), %s741_s11, 3 }
  0x40   : > { %s171_s26 = scalar_lea.sflag (!%p810_p12), [#allocation3], %s741_s11  ;;  %s174_s27 = scalar_lea.vmem (!%p810_p12), [#allocation2], %s395_s21 }
  0x44   : > { %580 = dma.done.wait (%p811_p1), %s171_s26, 128  }
  0x45   : > { %582 = vsyncadd (%p811_p1), %s171_s26, 4294967168  ;;  %p812_p4 = scmp.eq.s32.totalorder %s655_s16, 0 }
  0x47   : > { %584 = dma.done.wait (%p812_p4), [#allocation6], 512   ;;  %p813_p6 = pmov %p812_p4 }
  0x48   : > { %v611_v0 = vmov 0.0   ;;  %vm612_vm0 = vmmov 0   ;;  %v205_v1 = vld [vmem:[#allocation5 + $0x18] sm:$0xff]  ;;  %v204_v2 = vld [vmem:[#allocation5 + $0x10] sm:$0xff]  ;;  %v203_v3 = vld [vmem:[#allocation5 + $0x8] sm:$0xff]  ;;  %vm213_vm1 = vcmask 261120  }
  0x49   : > { %586 = vsyncadd (%p813_p6), [#allocation6], 4294966784  ;;  %409 = vmatprep.subr.mxu0 %v611_v0  ;;  %417 = vmatprep.mubr.msk.f32.mxu0 %vm612_vm0, %v611_v0  ;;  %v202_v4 = vld [vmem:[#allocation5] sm:$0xff]  ;;  %v201_v5 = vld [vmem:[%s174_s27] sm:$0xff]  ;;  %s401_s17 = sshll.u32 %s655_s16, 7  ;;  %s200_s22 = scalar_lea.vmem [#allocation7], %s395_s21 }
  0x4a   : > { %410 = vmatpush3.msra.mxu0 %v205_v1  ;;  %v398_v6 = vld [vmem:[%s797_s2] ss:$0 sm:$0xff]  ;;  %s308_s23 = sshll.u32 %s200_s22, 4  ;;  %s306_s29 = scalar_lea.hbm %s798_s3, %s401_s17  ;;  %s309_s23 = int_to_ptr.vmem [resolvable:$true] %s308_s23 }
  0x4b   : > { %411 = vmatprep.subr.mxu0 %v611_v0  ;;  %s295_s30 = scalar_lea.sflag [#allocation4], %s741_s11  ;;  %s537_s4 = scalar_lea.vmem %s309_s23, 128 }
  0x4c   : > { %412 = vmatpush3.msra.mxu0 %v204_v2  ;;  %p538_p8 = scmp.ne.s32.totalorder %s309_s23, %s537_s4  ;;  %p814_p3 = scmp.ne.s32.totalorder %s808_s6, 0 }
  0x4d   : > { %413 = vmatprep.subr.mxu0 %v611_v0  ;;  %s613_s8 = smov [#allocation7]  }
  0x4e   : > { %414 = vmatpush3.msra.mxu0 %v203_v3  ;;  %p539_p11 = pnand %p538_p8, %p814_p3  ;;  %s541_s7 = sshll.u32 %s613_s8, 4  ;;  %s542_s7 = int_to_ptr.vmem [resolvable:$false] %s541_s7 }
  0x4f   : > { %415 = vmatprep.subr.mxu0 %v611_v0  ;;  %s543_s16 = scalar_lea.vmem %s542_s7, 256  ;;  %p544_p10 = scmp.lt.s32.totalorder %s309_s23, %s542_s7 }
  0x50   : > { %416 = vmatpush3.msra.mxu0 %v202_v4  ;;  %p540_p7 = pneg %p539_p11  ;;  %p545_p2 = scmp.lt.s32.totalorder %s543_s16, %s537_s4 }
  0x51   : > { %418 = vmatmul.mubr.msk.f32.vlgmr.msra.gmra.mxu0 %vm213_vm1, %v201_v5 }
  0x52   : > { %p546_p13 = por %p545_p2, %p544_p10 }
  0x54   : > { %p547_p0 = pnand %p546_p13, %p540_p7 }
 0x111   : > { %v283_v7 = vpop.f32.mrf.mxu0 }
 0x112   : > { %v284_v8 = vadd.f32 %v398_v6, %v283_v7 }
 0x113   : > { %v419_v9 = vpop.f32.mrf.mxu0 }
 0x114   : > { %v287_v10 = vmul.f32 %v284_v8, %v284_v8 }
 0x116   : > { %288 = vadd.xlane.f32.xlu0 %v287_v10 }
 0x19f   : > { %v289_v11 = vpop.xlane.xlu0 %288 }
 0x1a0   : > { %v290_v12 = vmax.f32 %v289_v11, 1e-24 }
 0x1a2   : > { %481 = vrsqrt.f32 %v290_v12 }
 0x1af   : > { %v482_v13 = vpop.eup %481 }
 0x1b0   : > { %v292_v14 = vmul.f32 %v482_v13, %v284_v8 }
 0x1b2   : > { %293 = vst [vmem:[%s200_s22] sm:$0xff] %v292_v14 }
 0x1b3   : > { %550 = shalt.err (!%p547_p0)
}
 0x1b4   : > { %s551_s9 = scalar_lea.hbm %s306_s29, 128  ;;  %s555_s21 = scalar_lea.hbm %s798_s3, 256 }
 0x1b5   : > { %p552_p5 = scmp.ne.s32.totalorder %s306_s29, %s551_s9  ;;  %p556_p1 = scmp.lt.s32.totalorder %s306_s29, %s798_s3 }
 0x1b6   : > { %p557_p4 = scmp.lt.s32.totalorder %s555_s21, %s551_s9 }
 0x1b7   : > { %p553_p9 = pnand %p552_p5, %p814_p3 }
 0x1b8   : > { %p558_p6 = por %p557_p4, %p556_p1 }
 0x1b9   : > { %p554_p12 = pneg %p553_p9 }
 0x1bb   : > { %p559_p8 = pnand %p558_p6, %p554_p12 }
 0x1bd   : > { %562 = shalt.err (!%p559_p8)
}
 0x1be   : > { %426 = dma.vmem_to_hbm [thread:$0]  (%p814_p3), %s309_s23, 128, %s306_s29, %s295_s30  }
 0x1bf PF: > { %s320_s18 = sand.u32 1, %s593_s12   ;;  %p815_p11 = scmp.ne.s32.totalorder %s804_s19, 0 }
 0x1c0   : > { %p816_p7 = scmp.ge.s32.totalorder %s605_s15, 2  ;;  %s321_s20 = scalar_lea.sflag [#allocation4], %s320_s18 }
 0x1c2   : > { %p437_p10 = pnand %p816_p7, %p815_p11 }
 0x1c4   : > { %p438_p2 = pneg %p437_p10 }
 0x1c6   : > { %588 = dma.done.wait (%p438_p2), %s321_s20, 128  }
 0x1c7   : > { %590 = vsyncadd (%p438_p2), %s321_s20, 4294967168  ;;  %p17_p13 = scmp.ge.s32.totalorder %s688_s24, 4   ;;  %s817_s12 = smov %s597_s13 }
 0x1c8   : > { %s818_s13 = smov %s601_s14  ;;  %s819_s14 = smov %s705_s5 }
 0x1c9   : > { %s820_s15 = smov %s688_s24  ;;  %19 = sbr.rel (!%p17_p13) target bundleno = 6 (0x6), region = 81 }
 0x1ce   :  { %326 = vsyncpa [#allocation3], 1 }
 0x1cf   :  { %328 = vsyncpa [#allocation3 + $0x1], 1 }
 0x1d0   :  { %329 = vsyncpa [#allocation6], 1 }
 0x1d1   :  { %330 = vsyncpa [#allocation4], 1 }
 0x1d2   :  { %332 = vsyncpa [#allocation4 + $0x1], 1 }

</bundles_post_ra>
